<compile_context>
chip_gen: v7x
topology: tpu7x:2x2x1
jax: 0.10.0
libtpu: 0.0.40
codegen_flags: <defaults>
</compile_context>

<pallas_src>
import jax
import jax.numpy as jnp
from jax.experimental import pallas as pl
from jax.experimental.pallas import tpu as pltpu

IN_FEATURES = 30 * 45   # 1350
HIDDEN = 128


def _round_up(n, m):
    return (n + m - 1) // m * m


def dqn_lin_kernel(x_ref, w1_ref, b1_ref, w2_ref, b2_ref, w3_ref, b3_ref, o_ref):
    # x: (tm, 1350) f32 -> cast to bf16 in-kernel; weights bf16; biases f32.
    x = x_ref[...].astype(jnp.bfloat16)
    h1 = jnp.dot(x, w1_ref[...], preferred_element_type=jnp.float32) + b1_ref[...]
    h1 = jnp.maximum(h1, 0.0).astype(jnp.bfloat16)
    h2 = jnp.dot(h1, w2_ref[...], preferred_element_type=jnp.float32) + b2_ref[...]
    h2 = jnp.maximum(h2, 0.0).astype(jnp.bfloat16)
    o_ref[...] = (jnp.dot(h2, w3_ref[...], preferred_element_type=jnp.float32)
                  + b3_ref[...]).astype(o_ref.dtype)


def init_params(key, num_actions):
    """nn.Linear-style U(-1/sqrt(fan_in), 1/sqrt(fan_in)) init.
    Weights stored transposed: (in_features, out_features), f32."""
    def linear(k, fan_in, fan_out):
        kw, kb = jax.random.split(k)
        bound = 1.0 / jnp.sqrt(float(fan_in))
        w = jax.random.uniform(kw, (fan_in, fan_out), jnp.float32, -bound, bound)
        b = jax.random.uniform(kb, (1, fan_out), jnp.float32, -bound, bound)
        return w, b

    k1, k2, k3 = jax.random.split(key, 3)
    w1, b1 = linear(k1, IN_FEATURES, HIDDEN)
    w2, b2 = linear(k2, HIDDEN, HIDDEN)
    w3, b3 = linear(k3, HIDDEN, num_actions)
    return (w1, b1, w2, b2, w3, b3)


def pack_params(params):
    """Cast weights to bf16; pad the output projection to 128 lanes (lane-dense vst)."""
    w1, b1, w2, b2, w3, b3 = params
    num_actions = w3.shape[1]
    a_pad = _round_up(num_actions, 128)

    w3p = jnp.zeros((HIDDEN, a_pad), jnp.float32).at[:, :num_actions].set(w3)
    b3p = jnp.zeros((1, a_pad), jnp.float32).at[:, :num_actions].set(b3)

    return (w1.astype(jnp.bfloat16), b1.astype(jnp.float32),
            w2.astype(jnp.bfloat16), b2.astype(jnp.float32),
            w3p.astype(jnp.bfloat16), b3p)


def _choose_tile(batch, tile_m):
    """Pick a batch-tile size: multiple of 8 sublanes, >=2 grid steps when B > 8
    (v7x megacore sharding), minimal batch-padding waste."""
    b8 = _round_up(max(batch, 1), 8)
    if b8 <= 8:
        return b8
    steps = max(2, pl.cdiv(b8, tile_m))
    return _round_up(pl.cdiv(batch, steps), 8)


def dqn_lin_forward(x, packed, num_actions, *, tile_m=1024):
    """x: (B, ...) with prod(trailing dims) == 1350. Returns (B, num_actions) f32."""
    w1, b1, w2, b2, w3, b3 = packed
    B = x.shape[0]
    a_pad = w3.shape[1]

    # Flatten only (free reshape); no pad/cast materialization in the wrapper.
    x2 = x.reshape(B, -1).astype(jnp.float32)
    assert x2.shape[1] == IN_FEATURES, x2.shape

    tm = _choose_tile(B, tile_m)
    b_pad = _round_up(B, tm)
    if b_pad != B:
        x2 = jnp.pad(x2, ((0, b_pad - B), (0, 0)))
    grid = (b_pad // tm,)

    # Constant index_map -> weights/biases DMA'd once, VMEM-resident across steps.
    def const(shape):
        return pl.BlockSpec(shape, lambda i: tuple(0 for _ in shape))

    # VMEM budget: double-buffered x (f32) + out (f32) tiles + resident weights.
    weight_bytes = 2 * (w1.size * 2 + w2.size * 2 + w3.size * 2
                        + (b1.size + b2.size + b3.size) * 4)
    est = 2 * tm * IN_FEATURES * 4 + 2 * tm * a_pad * 4 + weight_bytes
    vmem_limit = min(max(32 << 20, int(est * 3 // 2)), 48 << 20)

    flops = 2 * b_pad * (IN_FEATURES * HIDDEN + HIDDEN * HIDDEN + HIDDEN * a_pad)
    bytes_accessed = (b_pad * IN_FEATURES * 4 + b_pad * a_pad * 4
                      + w1.size * 2 + w2.size * 2 + w3.size * 2
                      + (b1.size + b2.size + b3.size) * 4)

    out = pl.pallas_call(
        dqn_lin_kernel,
        out_shape=jax.ShapeDtypeStruct((b_pad, a_pad), jnp.float32),
        grid=grid,
        in_specs=[
            pl.BlockSpec((tm, IN_FEATURES), lambda i: (i, 0)),
            const(w1.shape), const(b1.shape),
            const(w2.shape), const(b2.shape),
            const(w3.shape), const(b3.shape),
        ],
        out_specs=pl.BlockSpec((tm, a_pad), lambda i: (i, 0)),
        compiler_params=pltpu.CompilerParams(
            dimension_semantics=("parallel",),
            vmem_limit_bytes=vmem_limit,
        ),
        cost_estimate=pl.CostEstimate(
            flops=flops, transcendentals=0, bytes_accessed=bytes_accessed),
    )(x2, w1, b1, w2, b2, w3, b3)

    return out[:B, :num_actions]


def reference_forward(x, packed, num_actions):
    """Pure-JAX reference matching the kernel's bf16-rounded math (f32 accumulate)."""
    w1, b1, w2, b2, w3, b3 = packed
    hi = jax.lax.Precision.HIGHEST
    B = x.shape[0]
    x2 = x.reshape(B, -1).astype(jnp.float32)
    x2 = x2.astype(jnp.bfloat16).astype(jnp.float32)
    h1 = jnp.maximum(jnp.dot(x2, w1.astype(jnp.float32), precision=hi) + b1, 0.0)
    h1 = h1.astype(jnp.bfloat16).astype(jnp.float32)
    h2 = jnp.maximum(jnp.dot(h1, w2.astype(jnp.float32), precision=hi) + b2, 0.0)
    h2 = h2.astype(jnp.bfloat16).astype(jnp.float32)
    out = jnp.dot(h2, w3.astype(jnp.float32), precision=hi) + b3
    return out[:, :num_actions]


if __name__ == "__main__":
    key = jax.random.PRNGKey(0)
    k_param, k_x = jax.random.split(key)

    num_actions = 4
    batch = 2
    params = init_params(k_param, num_actions)
    packed = pack_params(params)

    # Input shaped like the game screen the module flattens: (B, 30, 45).
    x = jax.random.normal(k_x, (batch, 30, 45), jnp.float32)

    out = dqn_lin_forward(x, packed, num_actions)
    out = jax.block_until_ready(out)

    ref = reference_forward(x, packed, num_actions)
    assert out.shape == (batch, num_actions), out.shape
    assert jnp.allclose(out, ref, atol=2e-3, rtol=2e-3), float(jnp.max(jnp.abs(out - ref)))

    print("KERNEL_OK")
</pallas_src>

<mosaic_0001>
module attributes {stable_mosaic.version = 11 : i64} {
  func.func @dqn_lin_kernel(%arg0: i32, %arg1: memref<8x1350xf32, #tpu.memory_space<vmem>>, %arg2: memref<1350x128xbf16, #tpu.memory_space<vmem>>, %arg3: memref<1x128xf32, #tpu.memory_space<vmem>>, %arg4: memref<128x128xbf16, #tpu.memory_space<vmem>>, %arg5: memref<1x128xf32, #tpu.memory_space<vmem>>, %arg6: memref<128x128xbf16, #tpu.memory_space<vmem>>, %arg7: memref<1x128xf32, #tpu.memory_space<vmem>>, %arg8: memref<8x128xf32, #tpu.memory_space<vmem>>) attributes {dimension_semantics = [#tpu.dimension_semantics<parallel>], iteration_bounds = array<i64: 1>, scalar_prefetch = 0 : i64, scratch_operands = 0 : i64, tpu.core_type = #tpu.core_type<tc>, window_params = [{transform_indices = @transform_0, window_bounds = array<i64: 8, 1350>}, {pipeline_mode = #tpu.pipeline_mode<synchronous>, transform_indices = @transform_1, window_bounds = array<i64: 1350, 128>}, {pipeline_mode = #tpu.pipeline_mode<synchronous>, transform_indices = @transform_2, window_bounds = array<i64: 1, 128>}, {pipeline_mode = #tpu.pipeline_mode<synchronous>, transform_indices = @transform_3, window_bounds = array<i64: 128, 128>}, {pipeline_mode = #tpu.pipeline_mode<synchronous>, transform_indices = @transform_4, window_bounds = array<i64: 1, 128>}, {pipeline_mode = #tpu.pipeline_mode<synchronous>, transform_indices = @transform_5, window_bounds = array<i64: 128, 128>}, {pipeline_mode = #tpu.pipeline_mode<synchronous>, transform_indices = @transform_6, window_bounds = array<i64: 1, 128>}, {transform_indices = @transform_7, window_bounds = array<i64: 8, 128>}]} {
    %c0 = arith.constant 0 : index
    %c0_0 = arith.constant 0 : index
    %0 = vector.load %arg1[%c0, %c0_0] : memref<8x1350xf32, #tpu.memory_space<vmem>>, vector<8x1350xf32>
    %1 = arith.truncf %0 : vector<8x1350xf32> to vector<8x1350xbf16>
    %c0_1 = arith.constant 0 : index
    %c0_2 = arith.constant 0 : index
    %2 = vector.load %arg2[%c0_1, %c0_2] : memref<1350x128xbf16, #tpu.memory_space<vmem>>, vector<1350x128xbf16>
    %cst = arith.constant dense<0.000000e+00> : vector<8x128xf32>
    %3 = tpu.matmul %1, %2, %cst {dimension_numbers = #tpu.dot_dimension_numbers<[1], [0], [0], [1], [0, 0, 1, 1], [], []>} : vector<8x1350xbf16>, vector<1350x128xbf16>, vector<8x128xf32> -> vector<8x128xf32>
    %c0_3 = arith.constant 0 : index
    %c0_4 = arith.constant 0 : index
    %4 = vector.load %arg3[%c0_3, %c0_4] : memref<1x128xf32, #tpu.memory_space<vmem>>, vector<1x128xf32>
    %5 = vector.broadcast %4 : vector<1x128xf32> to vector<8x128xf32>
    %6 = arith.addf %3, %5 : vector<8x128xf32>
    %cst_5 = arith.constant 0.000000e+00 : f32
    %7 = vector.broadcast %cst_5 : f32 to vector<8x128xf32>
    %8 = arith.maximumf %6, %7 : vector<8x128xf32>
    %9 = arith.truncf %8 : vector<8x128xf32> to vector<8x128xbf16>
    %c0_6 = arith.constant 0 : index
    %c0_7 = arith.constant 0 : index
    %10 = vector.load %arg4[%c0_6, %c0_7] : memref<128x128xbf16, #tpu.memory_space<vmem>>, vector<128x128xbf16>
    %cst_8 = arith.constant dense<0.000000e+00> : vector<8x128xf32>
    %11 = tpu.matmul %9, %10, %cst_8 {dimension_numbers = #tpu.dot_dimension_numbers<[1], [0], [0], [1], [0, 0, 1, 1], [], []>} : vector<8x128xbf16>, vector<128x128xbf16>, vector<8x128xf32> -> vector<8x128xf32>
    %c0_9 = arith.constant 0 : index
    %c0_10 = arith.constant 0 : index
    %12 = vector.load %arg5[%c0_9, %c0_10] : memref<1x128xf32, #tpu.memory_space<vmem>>, vector<1x128xf32>
    %13 = vector.broadcast %12 : vector<1x128xf32> to vector<8x128xf32>
    %14 = arith.addf %11, %13 : vector<8x128xf32>
    %cst_11 = arith.constant 0.000000e+00 : f32
    %15 = vector.broadcast %cst_11 : f32 to vector<8x128xf32>
    %16 = arith.maximumf %14, %15 : vector<8x128xf32>
    %17 = arith.truncf %16 : vector<8x128xf32> to vector<8x128xbf16>
    %c0_12 = arith.constant 0 : index
    %c0_13 = arith.constant 0 : index
    %18 = vector.load %arg6[%c0_12, %c0_13] : memref<128x128xbf16, #tpu.memory_space<vmem>>, vector<128x128xbf16>
    %cst_14 = arith.constant dense<0.000000e+00> : vector<8x128xf32>
    %19 = tpu.matmul %17, %18, %cst_14 {dimension_numbers = #tpu.dot_dimension_numbers<[1], [0], [0], [1], [0, 0, 1, 1], [], []>} : vector<8x128xbf16>, vector<128x128xbf16>, vector<8x128xf32> -> vector<8x128xf32>
    %c0_15 = arith.constant 0 : index
    %c0_16 = arith.constant 0 : index
    %20 = vector.load %arg7[%c0_15, %c0_16] : memref<1x128xf32, #tpu.memory_space<vmem>>, vector<1x128xf32>
    %21 = vector.broadcast %20 : vector<1x128xf32> to vector<8x128xf32>
    %22 = arith.addf %19, %21 : vector<8x128xf32>
    %c0_17 = arith.constant 0 : index
    %c0_18 = arith.constant 0 : index
    %23 = vector.load %arg8[%c0_17, %c0_18] : memref<8x128xf32, #tpu.memory_space<vmem>>, vector<8x128xf32>
    tpu.vector_store %arg8[%c0_17, %c0_18], %22 {strides = array<i32>} : memref<8x128xf32, #tpu.memory_space<vmem>>, vector<8x128xf32>,
    return
  }
  func.func @transform_0(%arg0: i32) -> (i32, i32) {
    %c0_i32 = arith.constant 0 : i32
    %c0_i32_0 = arith.constant 0 : i32
    return %arg0, %c0_i32 : i32, i32
  }
  func.func @transform_1(%arg0: i32) -> (i32, i32) {
    %c0_i32 = arith.constant 0 : i32
    %c0_i32_0 = arith.constant 0 : i32
    %c0_i32_1 = arith.constant 0 : i32
    return %c0_i32, %c0_i32_0 : i32, i32
  }
  func.func @transform_2(%arg0: i32) -> (i32, i32) {
    %c0_i32 = arith.constant 0 : i32
    %c0_i32_0 = arith.constant 0 : i32
    %c0_i32_1 = arith.constant 0 : i32
    return %c0_i32, %c0_i32_0 : i32, i32
  }
  func.func @transform_3(%arg0: i32) -> (i32, i32) {
    %c0_i32 = arith.constant 0 : i32
    %c0_i32_0 = arith.constant 0 : i32
    %c0_i32_1 = arith.constant 0 : i32
    return %c0_i32, %c0_i32_0 : i32, i32
  }
  func.func @transform_4(%arg0: i32) -> (i32, i32) {
    %c0_i32 = arith.constant 0 : i32
    %c0_i32_0 = arith.constant 0 : i32
    %c0_i32_1 = arith.constant 0 : i32
    return %c0_i32, %c0_i32_0 : i32, i32
  }
  func.func @transform_5(%arg0: i32) -> (i32, i32) {
    %c0_i32 = arith.constant 0 : i32
    %c0_i32_0 = arith.constant 0 : i32
    %c0_i32_1 = arith.constant 0 : i32
    return %c0_i32, %c0_i32_0 : i32, i32
  }
  func.func @transform_6(%arg0: i32) -> (i32, i32) {
    %c0_i32 = arith.constant 0 : i32
    %c0_i32_0 = arith.constant 0 : i32
    %c0_i32_1 = arith.constant 0 : i32
    return %c0_i32, %c0_i32_0 : i32, i32
  }
  func.func @transform_7(%arg0: i32) -> (i32, i32) {
    %c0_i32 = arith.constant 0 : i32
    %c0_i32_0 = arith.constant 0 : i32
    return %arg0, %c0_i32 : i32, i32
  }
}

</mosaic_0001>

<bundles_post_ra>
// kernel: tpu_custom_call.1
= control target key start
LH: loop header
LB: loop body
LE: loop exit
PB: predicated region body
PF: predicated region fallthrough
CT: control target
= control target key end

     0   :  { %12 = vsyncpa [#allocation3], 0  ;;  %s1954_s0 = inlined_call_operand.hbm [shape: f32[8,1350], index: 0, kind: input, shape index: {}]   ;;  %s1955_s1 = inlined_call_operand.hbm [shape: bf16[1350,128], index: 1, kind: input, shape index: {}]   ;;  %s1956_s2 = inlined_call_operand.vmem [shape: f32[1,128], index: 2, kind: input, shape index: {}]   ;;  %s1957_s3 = inlined_call_operand.hbm [shape: bf16[128,128], index: 3, kind: input, shape index: {}]   ;;  %s1958_s4 = inlined_call_operand.vmem [shape: f32[1,128], index: 4, kind: input, shape index: {}]   ;;  %s1959_s5 = inlined_call_operand.hbm [shape: bf16[128,128], index: 5, kind: input, shape index: {}]   ;;  %s1960_s6 = inlined_call_operand.vmem [shape: f32[1,128], index: 6, kind: input, shape index: {}]   ;;  %s1961_s7 = inlined_call_operand.hbm [shape: f32[8,128], index: 7, kind: output, shape index: {}]  }
   0x1   :  { %13 = vsyncpa [#allocation6], 0 }
   0x2   :  { %14 = vsyncpa [#allocation9], 0 }
   0x3   :  { %15 = vsyncpa [#allocation4], 0  ;;  %s1799_s24 = smov [#allocation5]   ;;  %s1681_s28 = scalar_lea.hbm %s1955_s1, 10816 }
   0x4   :  { %s31_s25 = sshll.u32 %s1799_s24, 4  ;;  %p1682_p0 = scmp.ne.s32.totalorder %s1955_s1, %s1681_s28  ;;  %s32_s25 = int_to_ptr.vmem [resolvable:$true] %s31_s25 }
   0x5   :  { %p1685_p1 = scmp.lt.u32.totalorder %s1681_s28, %s1955_s1 }
   0x7   :  { %p1687_p2 = pnand %p1685_p1, %p1682_p0 }
   0x9   :  { %1690 = shalt.err (!%p1687_p2)
}
   0xa   :  { %s1691_s10 = scalar_lea.vmem %s32_s25, 10816  ;;  %p1696_p4 = scmp.lt.s32.totalorder %s32_s25, %s32_s25 }
   0xb   :  { %p1692_p3 = scmp.ne.s32.totalorder %s32_s25, %s1691_s10  ;;  %p1697_p5 = scmp.lt.s32.totalorder %s1691_s10, %s1691_s10 }
   0xd   :  { %p1698_p6 = por %p1697_p5, %p1696_p4 }
   0xf   :  { %p1699_p7 = pnand %p1698_p6, %p1692_p3 }
  0x11   :  { %1702 = shalt.err (!%p1699_p7)
}
  0x12   :  { %s1800_s11 = smov 64   ;;  %s1801_s12 = smov 4  }
  0x13   :  { %37 = dma.hbm_to_vmem [thread:$0]  %s1955_s1, 10816, %s32_s25, [#allocation6], %s1800_s11, %s1800_s11, %s1801_s12  }
  0x14   :  { %s1802_s15 = smov [#allocation2]   ;;  %s1803_s17 = smov [#allocation7]  }
  0x15   :  { %s22_s16 = sshll.u32 %s1802_s15, 4  ;;  %s45_s18 = sshll.u32 %s1803_s17, 4  ;;  %s23_s16 = int_to_ptr.vmem [resolvable:$true] %s22_s16  ;;  %s46_s18 = int_to_ptr.vmem [resolvable:$true] %s45_s18 }
  0x16   :  { %s1703_s21 = scalar_lea.hbm %s1954_s0, 1408 }
  0x17   :  { %p1704_p8 = scmp.ne.s32.totalorder %s1954_s0, %s1703_s21  ;;  %p1707_p9 = scmp.lt.u32.totalorder %s1703_s21, %s1954_s0 }
  0x19   :  { %p1709_p10 = pnand %p1707_p9, %p1704_p8 }
  0x1b   :  { %1712 = shalt.err (!%p1709_p10)
}
  0x1c   :  { %s1713_s1 = scalar_lea.vmem %s23_s16, 1408  ;;  %p1718_p12 = scmp.lt.s32.totalorder %s23_s16, %s23_s16 }
  0x1d   :  { %p1714_p11 = scmp.ne.s32.totalorder %s23_s16, %s1713_s1  ;;  %p1719_p13 = scmp.lt.s32.totalorder %s1713_s1, %s1713_s1 }
  0x1f   :  { %p1720_p0 = por %p1719_p13, %p1718_p12 }
  0x21   :  { %p1721_p1 = pnand %p1720_p0, %p1714_p11 }
  0x23   :  { %1724 = shalt.err (!%p1721_p1)
}
  0x24   :  { %25 = dma.hbm_to_vmem [thread:$0]  %s1954_s0, 1408, %s23_s16, [#allocation3]  }
  0x25   :  { %s1725_s30 = scalar_lea.hbm %s1957_s3, 1024 }
  0x26   :  { %p1726_p2 = scmp.ne.s32.totalorder %s1957_s3, %s1725_s30  ;;  %p1729_p3 = scmp.lt.u32.totalorder %s1725_s30, %s1957_s3 }
  0x28   :  { %p1731_p4 = pnand %p1729_p3, %p1726_p2 }
  0x2a   :  { %1734 = shalt.err (!%p1731_p4)
}
  0x2b   :  { %s1735_s14 = scalar_lea.vmem %s46_s18, 1024  ;;  %p1740_p6 = scmp.lt.s32.totalorder %s46_s18, %s46_s18 }
  0x2c   :  { %p1736_p5 = scmp.ne.s32.totalorder %s46_s18, %s1735_s14  ;;  %p1741_p7 = scmp.lt.s32.totalorder %s1735_s14, %s1735_s14 }
  0x2e   :  { %p1742_p8 = por %p1741_p7, %p1740_p6 }
  0x30   :  { %p1743_p9 = pnand %p1742_p8, %p1736_p5 }
  0x32   :  { %1746 = shalt.err (!%p1743_p9)
}
  0x33   :  { %51 = dma.hbm_to_vmem [thread:$0]  %s1957_s3, 1024, %s46_s18, [#allocation6], %s1800_s11, %s1800_s11, %s1801_s12  }
  0x34   :  { %s1804_s16 = smov [#allocation8]   ;;  %s1747_s21 = scalar_lea.hbm %s1959_s5, 1024 }
  0x35   :  { %s59_s17 = sshll.u32 %s1804_s16, 4  ;;  %p1748_p10 = scmp.ne.s32.totalorder %s1959_s5, %s1747_s21  ;;  %s60_s17 = int_to_ptr.vmem [resolvable:$true] %s59_s17 }
  0x36   :  { %p1751_p11 = scmp.lt.u32.totalorder %s1747_s21, %s1959_s5 }
  0x38   :  { %p1753_p12 = pnand %p1751_p11, %p1748_p10 }
  0x3a   :  { %1756 = shalt.err (!%p1753_p12)
}
  0x3b   :  { %s1757_s1 = scalar_lea.vmem %s60_s17, 1024  ;;  %p1762_p0 = scmp.lt.s32.totalorder %s60_s17, %s60_s17 }
  0x3c   :  { %p1758_p13 = scmp.ne.s32.totalorder %s60_s17, %s1757_s1  ;;  %p1763_p1 = scmp.lt.s32.totalorder %s1757_s1, %s1757_s1 }
  0x3e   :  { %p1764_p2 = por %p1763_p1, %p1762_p0 }
  0x40   :  { %p1765_p3 = pnand %p1764_p2, %p1758_p13 }
  0x42   :  { %1768 = shalt.err (!%p1765_p3)
}
  0x43   :  { %65 = dma.hbm_to_vmem [thread:$0]  %s1959_s5, 1024, %s60_s17, [#allocation9], %s1800_s11, %s1800_s11, %s1801_s12  }
  0x44   :  { %1791 = dma.done.wait [#allocation3], 1408  }
  0x45   :  { %1792 = vsyncadd [#allocation3], 4294965888 }
  0x46   :  { %1793 = dma.done.wait [#allocation6], 11840  }
  0x47   :  { %1794 = vsyncadd [#allocation6], 4294955456 }
  0x48   :  { %1795 = dma.done.wait [#allocation9], 1024  }
  0x49   :  { %1796 = vsyncadd [#allocation9], 4294966272  ;;  %v1580_v0 = vld [vmem:[#allocation5 + $0x40] sm:$0xff]   ;;  %v1584_v4 = vld [vmem:[#allocation5 + $0x48] sm:$0xff]   ;;  %vm1806_vm0 = vmmov 0   ;;  %vm790_vm1 = vcmask 1042432  }
  0x4a   :  { %v1581_v1 = vld [vmem:[#allocation5] sm:$0xff]   ;;  %1383 = vmatprep.subr.bf16.mxu0 %v1580_v0  ;;  %v1585_v5 = vld [vmem:[#allocation5 + $0x8] sm:$0xff]   ;;  %v1588_v8 = vld [vmem:[#allocation5 + $0x50] sm:$0xff]   ;;  %vm786_vm2 = vcmask 572416   ;;  %s1807_s28 = smov [#allocation10]  }
  0x4b   :  { %v1582_v2 = vld [vmem:[#allocation5 + $0xc0] sm:$0xff]   ;;  %1384 = vmatpush3.bf16.msra.mxu0 %v1581_v1  ;;  %v1586_v6 = vld [vmem:[#allocation5 + $0xc8] sm:$0xff]   ;;  %v1589_v9 = vld [vmem:[#allocation5 + $0x10] sm:$0xff]   ;;  %s1267_s29 = sshll.u32 %s1807_s28, 4  ;;  %s1268_s29 = int_to_ptr.vmem [resolvable:$true] %s1267_s29 }
  0x4c   :  { %v1583_v3 = vld [vmem:[#allocation5 + $0x80] sm:$0xff]   ;;  %1405 = vmatprep.subr.bf16.mxu1 %v1582_v2  ;;  %1385 = vmatprep.subr.bf16.mxu0 %v1584_v4  ;;  %v1587_v7 = vld [vmem:[#allocation5 + $0x88] sm:$0xff]   ;;  %v1590_v10 = vld [vmem:[#allocation5 + $0xd0] sm:$0xff]   ;;  %p1774_p5 = scmp.lt.s32.totalorder %s1268_s29, %s1268_s29 }
  0x4d   :  { %1406 = vmatpush3.bf16.msra.mxu1 %v1583_v3  ;;  %v1591_v11 = vld [vmem:[#allocation5 + $0x90] sm:$0xff]   ;;  %v1592_v12 = vld [vmem:[#allocation5 + $0x58] sm:$0xff]   ;;  %v1596_v16 = vld [vmem:[#allocation5 + $0x60] sm:$0xff]  }
  0x4e   :  { %1407 = vmatprep.subr.bf16.mxu1 %v1586_v6  ;;  %v1593_v13 = vld [vmem:[#allocation5 + $0x18] sm:$0xff]   ;;  %v1597_v17 = vld [vmem:[#allocation5 + $0x20] sm:$0xff]   ;;  %v1600_v20 = vld [vmem:[#allocation5 + $0x68] sm:$0xff]  }
  0x4f   :  { %1386 = vmatpush3.bf16.msra.mxu0 %v1585_v5  ;;  %v1594_v14 = vld [vmem:[#allocation5 + $0xd8] sm:$0xff]   ;;  %v1598_v18 = vld [vmem:[#allocation5 + $0xe0] sm:$0xff]   ;;  %v1601_v21 = vld [vmem:[#allocation5 + $0x28] sm:$0xff]  }
  0x50   :  { %1387 = vmatprep.subr.bf16.mxu0 %v1588_v8  ;;  %v1595_v15 = vld [vmem:[#allocation5 + $0x98] sm:$0xff]   ;;  %v1599_v19 = vld [vmem:[#allocation5 + $0xa0] sm:$0xff]   ;;  %v1602_v22 = vld [vmem:[#allocation5 + $0xe8] sm:$0xff]  }
  0x51   :  { %1408 = vmatpush3.bf16.msra.mxu1 %v1587_v7  ;;  %v1603_v23 = vld [vmem:[#allocation5 + $0xa8] sm:$0xff]   ;;  %v1604_v24 = vld [vmem:[#allocation5 + $0x70] sm:$0xff]   ;;  %v1608_v28 = vld [vmem:[#allocation5 + $0x78] sm:$0xff]  }
  0x52   :  { %1409 = vmatprep.subr.bf16.mxu1 %v1590_v10  ;;  %v1605_v25 = vld [vmem:[#allocation5 + $0x30] sm:$0xff]   ;;  %v1609_v29 = vld [vmem:[#allocation5 + $0x38] sm:$0xff]   ;;  %v81_v34 = vld [vmem:[#allocation2] sm:$0xff] }
  0x53   :  { %1388 = vmatpush3.bf16.msra.mxu0 %v1589_v9  ;;  %v1606_v26 = vld [vmem:[#allocation5 + $0xf0] sm:$0xff]   ;;  %v1610_v30 = vld [vmem:[#allocation5 + $0xf8] sm:$0xff]   ;;  %v92_v35 = vpack.c.bf16 %v81_v34, %v81_v34  ;;  %v1612_v36 = vld [vmem:[#allocation5 + $0x140] sm:$0xff]  }
  0x54   :  { %1389 = vmatprep.subr.bf16.mxu0 %v1592_v12  ;;  %v1607_v27 = vld [vmem:[#allocation5 + $0xb0] sm:$0xff]   ;;  %v1611_v33 = vld [vmem:[#allocation5 + $0xb8] sm:$0xff]   ;;  %v84_v37 = vld [vmem:[#allocation2 + $0x18] sm:$0xff] }
  0x55   :  { %1410 = vmatpush3.bf16.msra.mxu1 %v1591_v11  ;;  %v82_v31 = vld [vmem:[#allocation2 + $0x8] sm:$0xff]  ;;  %v95_v38 = vpack.c.bf16 %v84_v37, %v84_v37  ;;  %v1613_v39 = vld [vmem:[#allocation5 + $0x100] sm:$0xff]   ;;  %v83_v40 = vld [vmem:[#allocation2 + $0x10] sm:$0xff] }
  0x56   :  { %1411 = vmatprep.subr.bf16.mxu1 %v1594_v14  ;;  %v93_v32 = vpack.c.bf16 %v82_v31, %v82_v31  ;;  %v94_v41 = vpack.c.bf16 %v83_v40, %v83_v40  ;;  %v1614_v42 = vld [vmem:[#allocation5 + $0x1c0] sm:$0xff]   ;;  %v1616_v44 = vld [vmem:[#allocation5 + $0x148] sm:$0xff]   ;;  %v1620_v48 = vld [vmem:[#allocation5 + $0x150] sm:$0xff]  }
  0x57   :  { %1390 = vmatpush3.bf16.msra.mxu0 %v1593_v13  ;;  %866 = vmatprep.mubr.bf16.mxu1 %v95_v38  ;;  %v1615_v43 = vld [vmem:[#allocation5 + $0x180] sm:$0xff]   ;;  %v1617_v45 = vld [vmem:[#allocation5 + $0x108] sm:$0xff]   ;;  %v1621_v49 = vld [vmem:[#allocation5 + $0x110] sm:$0xff]  }
  0x58   :  { %1391 = vmatprep.subr.bf16.mxu0 %v1596_v16  ;;  %826 = vmatprep.mubr.bf16.mxu0 %v93_v32  ;;  %v1618_v46 = vld [vmem:[#allocation5 + $0x1c8] sm:$0xff]   ;;  %v1622_v50 = vld [vmem:[#allocation5 + $0x1d0] sm:$0xff]   ;;  %v1624_v52 = vld [vmem:[#allocation5 + $0x158] sm:$0xff]  }
  0x59   :  { %1412 = vmatpush3.bf16.msra.mxu1 %v1595_v15  ;;  %v1619_v47 = vld [vmem:[#allocation5 + $0x188] sm:$0xff]   ;;  %v1623_v51 = vld [vmem:[#allocation5 + $0x190] sm:$0xff]   ;;  %v1625_v53 = vld [vmem:[#allocation5 + $0x118] sm:$0xff]  }
  0x5a   :  { %1413 = vmatprep.subr.bf16.mxu1 %v1598_v18  ;;  %v1626_v54 = vld [vmem:[#allocation5 + $0x1d8] sm:$0xff]   ;;  %v1628_v56 = vld [vmem:[#allocation5 + $0x160] sm:$0xff]   ;;  %v1632_v60 = vld [vmem:[#allocation5 + $0x168] sm:$0xff]  }
  0x5b   :  { %1392 = vmatpush3.bf16.msra.mxu0 %v1597_v17  ;;  %v1627_v55 = vld [vmem:[#allocation5 + $0x198] sm:$0xff]   ;;  %v1629_v57 = vld [vmem:[#allocation5 + $0x120] sm:$0xff]   ;;  %v1633_v61 = vld [vmem:[#allocation5 + $0x128] sm:$0xff]  }
  0x5c   :  { %1393 = vmatprep.subr.bf16.mxu0 %v1600_v20  ;;  %v1630_v58 = vld [vmem:[#allocation5 + $0x1e0] sm:$0xff]   ;;  %v1634_v62 = vld [vmem:[#allocation5 + $0x1e8] sm:$0xff]   ;;  %v1636_v0 = vld [vmem:[#allocation5 + $0x170] sm:$0xff]  }
  0x5d   :  { %1414 = vmatpush3.bf16.msra.mxu1 %v1599_v19  ;;  %v1631_v59 = vld [vmem:[#allocation5 + $0x1a0] sm:$0xff]   ;;  %v1635_v63 = vld [vmem:[#allocation5 + $0x1a8] sm:$0xff]   ;;  %v1637_v1 = vld [vmem:[#allocation5 + $0x130] sm:$0xff]   ;;  %v1805_v19 = vmov 0.0  }
  0x5e   :  { %1415 = vmatprep.subr.bf16.mxu1 %v1602_v22  ;;  %v1638_v2 = vld [vmem:[#allocation5 + $0x1f0] sm:$0xff]   ;;  %v1640_v4 = vld [vmem:[#allocation5 + $0x178] sm:$0xff]   ;;  %v85_v10 = vld [vmem:[#allocation2 + $0x20] sm:$0xff] }
  0x5f   :  { %1394 = vmatpush3.bf16.msra.mxu0 %v1601_v21  ;;  %v1639_v3 = vld [vmem:[#allocation5 + $0x1b0] sm:$0xff]   ;;  %v1641_v5 = vld [vmem:[#allocation5 + $0x138] sm:$0xff]   ;;  %v96_v11 = vpack.c.bf16 %v85_v10, %v85_v10  ;;  %v1644_v12 = vld [vmem:[#allocation5 + $0x240] sm:$0xff]  }
  0x60   :  { %1395 = vmatprep.subr.bf16.mxu0 %v1604_v24  ;;  %v1642_v6 = vld [vmem:[#allocation5 + $0x1f8] sm:$0xff]   ;;  %v86_v7 = vld [vmem:[#allocation2 + $0x28] sm:$0xff]  ;;  %v88_v13 = vld [vmem:[#allocation2 + $0x38] sm:$0xff] }
  0x61   :  { %1416 = vmatpush3.bf16.msra.mxu1 %v1603_v23  ;;  %v97_v8 = vpack.c.bf16 %v86_v7, %v86_v7  ;;  %v1643_v9 = vld [vmem:[#allocation5 + $0x1b8] sm:$0xff]   ;;  %v99_v14 = vpack.c.bf16 %v88_v13, %v88_v13  ;;  %v1645_v15 = vld [vmem:[#allocation5 + $0x200] sm:$0xff]   ;;  %v1646_v18 = vld [vmem:[#allocation5 + $0x248] sm:$0xff]  }
  0x62   :  { %1417 = vmatprep.subr.bf16.mxu1 %v1606_v26  ;;  %v87_v16 = vld [vmem:[#allocation2 + $0x30] sm:$0xff]  ;;  %v1647_v20 = vld [vmem:[#allocation5 + $0x208] sm:$0xff]   ;;  %v1648_v21 = vld [vmem:[#allocation5 + $0x250] sm:$0xff]  }
  0x63   :  { %1396 = vmatpush3.bf16.msra.mxu0 %v1605_v25  ;;  %v98_v17 = vpack.c.bf16 %v87_v16, %v87_v16  ;;  %v1649_v22 = vld [vmem:[#allocation5 + $0x210] sm:$0xff]   ;;  %v1650_v23 = vld [vmem:[#allocation5 + $0x258] sm:$0xff]   ;;  %v1652_v24 = vld [vmem:[#allocation5 + $0x280] sm:$0xff]  }
  0x64   :  { %1397 = vmatprep.subr.bf16.mxu0 %v1608_v28  ;;  %v1651_v25 = vld [vmem:[#allocation5 + $0x218] sm:$0xff]   ;;  %v1655_v26 = vld [vmem:[#allocation5 + $0x288] sm:$0xff]   ;;  %v1658_v28 = vld [vmem:[#allocation5 + $0x290] sm:$0xff]  }
  0x65   :  { %1418 = vmatpush3.bf16.msra.mxu1 %v1607_v27  ;;  %v1653_v27 = vld [vmem:[#allocation5 + $0x260] sm:$0xff]   ;;  %v1661_v31 = vld [vmem:[#allocation5 + $0x298] sm:$0xff]   ;;  %v1657_v32 = vld [vmem:[#allocation5 + $0x228] sm:$0xff]  }
  0x66   :  { %1419 = vmatprep.subr.bf16.mxu1 %v1610_v30  ;;  %v1656_v30 = vld [vmem:[#allocation5 + $0x268] sm:$0xff]   ;;  %v1659_v34 = vld [vmem:[#allocation5 + $0x270] sm:$0xff]   ;;  %v1662_v38 = vld [vmem:[#allocation5 + $0x278] sm:$0xff]  }
  0x67   :  { %1398 = vmatpush3.bf16.msra.mxu0 %v1609_v29  ;;  %v1654_v29 = vld [vmem:[#allocation5 + $0x220] sm:$0xff]   ;;  %v1660_v37 = vld [vmem:[#allocation5 + $0x230] sm:$0xff]   ;;  %v91_v40 = vld [vmem:[#allocation2 + $0x50] sm:$0xff] }
  0x68   :  { %1427 = vmatprep.subr.bf16.mxu0 %v1612_v36  ;;  %v1664_v36 = vld [vmem:[#allocation5 + $0x2a0] ss:$0 sps:$4 sm:$0x77]  }
  0x69   :  { %1420 = vmatpush3.bf16.msra.mxu1 %v1611_v33  ;;  %v90_v33 = vld [vmem:[#allocation2 + $0x48] sm:$0xff] }
  0x6a   :  { %827 = vmatmul.mubr.bf16.vlgmr.msra.gmra.mrb[0].mxu0 %v92_v35  ;;  %1449 = vmatprep.subr.bf16.mxu1 %v1614_v42  ;;  %v101_v35 = vpack.c.bf16 %v90_v33, %v90_v33  ;;  %v89_v42 = vld [vmem:[#allocation2 + $0x40] sm:$0xff] }
  0x6b   :  { %1428 = vmatpush3.bf16.msra.mxu0 %v1613_v39  ;;  %906 = vmatprep.mubr.bf16.mxu0 %v97_v8  ;;  %v792_v39 = vsel %vm790_vm1, %v1664_v36, 0  ;;  %v1365_v36 = vld [vmem:[%s1958_s4] ss:$0 sm:$0xff]  ;;  %s1769_s4 = scalar_lea.vmem %s1268_s29, 128 }
  0x6c   :  { %867 = vmatmul.mubr.bf16.vlgmr.msra.gmra.mrb[0].mxu1 %v94_v41  ;;  %1429 = vmatprep.subr.bf16.mxu0 %v1616_v44  ;;  %v1663_v41 = vld [vmem:[#allocation5 + $0x238] sm:$0xff]   ;;  %v100_v44 = vpack.c.bf16 %v89_v42, %v89_v42  ;;  %p1770_p4 = scmp.ne.s32.totalorder %s1268_s29, %s1769_s4  ;;  %p1775_p6 = scmp.lt.s32.totalorder %s1769_s4, %s1769_s4 }
  0x6d   :  { %1450 = vmatpush3.bf16.msra.mxu1 %v1615_v43  ;;  %946 = vmatprep.mubr.bf16.mxu1 %v99_v14  ;;  %v102_v43 = vpack.c.bf16 %v91_v40, %v91_v40 }
  0x6e   :  { %1451 = vmatprep.subr.bf16.mxu1 %v1618_v46  ;;  %v1666_v46 = vld [vmem:[#allocation7 + $0x8] sm:$0xff]   ;;  %p1776_p7 = por %p1775_p6, %p1774_p5 }
  0x6f   :  { %1430 = vmatpush3.bf16.msra.mxu0 %v1617_v45  ;;  %v1665_v45 = vld [vmem:[#allocation7] sm:$0xff]  }
  0x70   :  { %1431 = vmatprep.subr.bf16.mxu0 %v1620_v48  ;;  %v1668_v48 = vld [vmem:[#allocation7 + $0x18] sm:$0xff]   ;;  %p1777_p8 = pnand %p1776_p7, %p1770_p4 }
  0x71   :  { %1452 = vmatpush3.bf16.msra.mxu1 %v1619_v47  ;;  %v1667_v47 = vld [vmem:[#allocation7 + $0x10] sm:$0xff]  }
  0x72   :  { %1453 = vmatprep.subr.bf16.mxu1 %v1622_v50  ;;  %v1670_v50 = vld [vmem:[#allocation7 + $0x28] sm:$0xff]  }
  0x73   :  { %1432 = vmatpush3.bf16.msra.mxu0 %v1621_v49  ;;  %v1669_v49 = vld [vmem:[#allocation7 + $0x20] sm:$0xff]  }
  0x74   :  { %1433 = vmatprep.subr.bf16.mxu0 %v1624_v52  ;;  %v1672_v52 = vld [vmem:[#allocation7 + $0x38] sm:$0xff]  }
  0x75   :  { %1454 = vmatpush3.bf16.msra.mxu1 %v1623_v51  ;;  %v1671_v51 = vld [vmem:[#allocation7 + $0x30] sm:$0xff]  }
  0x76   :  { %1455 = vmatprep.subr.bf16.mxu1 %v1626_v54  ;;  %v1674_v54 = vld [vmem:[#allocation8 + $0x8] sm:$0xff]  }
  0x77   :  { %1434 = vmatpush3.bf16.msra.mxu0 %v1625_v53  ;;  %v1673_v53 = vld [vmem:[#allocation8] sm:$0xff]  }
  0x78   :  { %1435 = vmatprep.subr.bf16.mxu0 %v1628_v56  ;;  %v1676_v56 = vld [vmem:[#allocation8 + $0x18] sm:$0xff]  }
  0x79   :  { %1456 = vmatpush3.bf16.msra.mxu1 %v1627_v55  ;;  %v1675_v55 = vld [vmem:[#allocation8 + $0x10] sm:$0xff]  }
  0x7a   :  { %1457 = vmatprep.subr.bf16.mxu1 %v1630_v58  ;;  %v1678_v58 = vld [vmem:[#allocation8 + $0x28] sm:$0xff]  }
  0x7b   :  { %1436 = vmatpush3.bf16.msra.mxu0 %v1629_v57  ;;  %v1677_v57 = vld [vmem:[#allocation8 + $0x20] sm:$0xff]  }
  0x7c   :  { %1437 = vmatprep.subr.bf16.mxu0 %v1632_v60  ;;  %v1278_v60 = vld [vmem:[%s1956_s2] ss:$0 sm:$0xff] }
  0x7d   :  { %1458 = vmatpush3.bf16.msra.mxu1 %v1631_v59 }
  0x7e   :  { %1459 = vmatprep.subr.bf16.mxu1 %v1634_v62 }
  0x7f   :  { %1438 = vmatpush3.bf16.msra.mxu0 %v1633_v61 }
  0x80   :  { %1439 = vmatprep.subr.bf16.mxu0 %v1636_v0 }
  0x81   :  { %1460 = vmatpush3.bf16.msra.mxu1 %v1635_v63 }
  0x82   :  { %1461 = vmatprep.subr.bf16.mxu1 %v1638_v2 }
  0x83   :  { %1440 = vmatpush3.bf16.msra.mxu0 %v1637_v1 }
  0x84   :  { %1441 = vmatprep.subr.bf16.mxu0 %v1640_v4 }
  0x85   :  { %1462 = vmatpush3.bf16.msra.mxu1 %v1639_v3 }
  0x86   :  { %1463 = vmatprep.subr.bf16.mxu1 %v1642_v6 }
  0x87   :  { %1442 = vmatpush3.bf16.msra.mxu0 %v1641_v5 }
  0x88   :  { %1471 = vmatprep.subr.bf16.mxu0 %v1644_v12 }
  0x89   :  { %1464 = vmatpush3.bf16.msra.mxu1 %v1643_v9 }
  0x8a   :  { %907 = vmatmul.mubr.bf16.vlgmr.msra.gmra.mrb[4].mxu0 %v96_v11  ;;  %1517 = vmatprep.subr.bf16.mxu1 %v1805_v19 }
  0x8b   :  { %1472 = vmatpush3.bf16.msra.mxu0 %v1645_v15  ;;  %986 = vmatprep.mubr.bf16.mxu0 %v101_v35  ;;  %v1680_v35 = vld [vmem:[#allocation8 + $0x38] sm:$0xff]  }
  0x8c   :  { %947 = vmatmul.mubr.bf16.vlgmr.msra.gmra.mrb[4].mxu1 %v98_v17  ;;  %1473 = vmatprep.subr.bf16.mxu0 %v1646_v18 }
  0x8d   :  { %1527 = vmatprep.mubr.msk.bf16.mxu1 %vm1806_vm0, %v1805_v19  ;;  %1518 = vmatpush3.bf16.msra.mxu1 %v1652_v24 }
  0x8e   :  { %1519 = vmatprep.subr.bf16.mxu1 %v1805_v19 }
  0x8f   :  { %1474 = vmatpush3.bf16.msra.mxu0 %v1647_v20 }
  0x90   :  { %1475 = vmatprep.subr.bf16.mxu0 %v1648_v21 }
  0x91   :  { %1520 = vmatpush3.bf16.msra.mxu1 %v1655_v26 }
  0x92   :  { %1521 = vmatprep.subr.bf16.mxu1 %v1805_v19 }
  0x93   :  { %1476 = vmatpush3.bf16.msra.mxu0 %v1649_v22 }
  0x94   :  { %1477 = vmatprep.subr.bf16.mxu0 %v1650_v23 }
  0x95   :  { %1522 = vmatpush3.bf16.msra.mxu1 %v1658_v28 }
  0x96   :  { %1523 = vmatprep.subr.bf16.mxu1 %v1805_v19 }
  0x97   :  { %1478 = vmatpush3.bf16.msra.mxu0 %v1651_v25 }
  0x98   :  { %1479 = vmatprep.subr.bf16.mxu0 %v1653_v27 }
  0x99   :  { %1524 = vmatpush3.bf16.msra.mxu1 %v1661_v31 }
  0x9a   :  { %1525 = vmatprep.subr.bf16.mxu1 %v1805_v19 }
  0x9b   :  { %1480 = vmatpush3.bf16.msra.mxu0 %v1654_v29 }
  0x9c   :  { %1481 = vmatprep.subr.bf16.mxu0 %v1656_v30 }
  0x9d   :  { %1526 = vmatpush3.bf16.msra.mxu1 %v792_v39 }
  0x9e   :  { %1531 = vmatprep.subr.bf16.mxu1 %v1805_v19 }
  0x9f   :  { %1482 = vmatpush3.bf16.msra.mxu0 %v1657_v32 }
  0xa0   :  { %1483 = vmatprep.subr.bf16.mxu0 %v1659_v34  ;;  %1528 = vmatmul.mubr.msk.bf16.vlgmr.msra.gmra.mrb[8].mxu1 %vm786_vm2, %v102_v43  ;;  %v1679_v34 = vld [vmem:[#allocation8 + $0x30] sm:$0xff]  }
  0xa1   :  { %1547 = vmatprep.mubr.msk.bf16.mxu1 %vm1806_vm0, %v1805_v19  ;;  %1532 = vmatpush3.bf16.msra.mxu1 %v1665_v45 }
  0xa2   :  { %1533 = vmatprep.subr.bf16.mxu1 %v1805_v19 }
  0xa3   :  { %1484 = vmatpush3.bf16.msra.mxu0 %v1660_v37 }
  0xa4   :  { %1485 = vmatprep.subr.bf16.mxu0 %v1662_v38 }
  0xa5   :  { %1534 = vmatpush3.bf16.msra.mxu1 %v1666_v46 }
  0xa6   :  { %1535 = vmatprep.subr.bf16.mxu1 %v1805_v19 }
  0xa7   :  { %1486 = vmatpush3.bf16.msra.mxu0 %v1663_v41 }
  0xa8   :  { %1551 = vmatprep.subr.bf16.mxu0 %v1805_v19 }
  0xa9   :  { %1536 = vmatpush3.bf16.msra.mxu1 %v1667_v47 }
  0xaa   :  { %987 = vmatmul.mubr.bf16.vlgmr.msra.gmra.mrb[8].mxu0 %v100_v44  ;;  %1537 = vmatprep.subr.bf16.mxu1 %v1805_v19  ;;  %v1374_v44 = vld [vmem:[%s1960_s6] ss:$0 sm:$0xff] }
  0xab   :  { %1567 = vmatprep.mubr.msk.bf16.mxu0 %vm1806_vm0, %v1805_v19  ;;  %1552 = vmatpush3.bf16.msra.mxu0 %v1673_v53 }
  0xac   :  { %1553 = vmatprep.subr.bf16.mxu0 %v1805_v19 }
  0xad   :  { %1538 = vmatpush3.bf16.msra.mxu1 %v1668_v48 }
  0xae   :  { %1539 = vmatprep.subr.bf16.mxu1 %v1805_v19 }
  0xaf   :  { %1554 = vmatpush3.bf16.msra.mxu0 %v1674_v54 }
  0xb0   :  { %1555 = vmatprep.subr.bf16.mxu0 %v1805_v19 }
  0xb1   :  { %1540 = vmatpush3.bf16.msra.mxu1 %v1669_v49 }
  0xb2   :  { %1541 = vmatprep.subr.bf16.mxu1 %v1805_v19 }
  0xb3   :  { %1556 = vmatpush3.bf16.msra.mxu0 %v1675_v55 }
  0xb4   :  { %1557 = vmatprep.subr.bf16.mxu0 %v1805_v19 }
  0xb5   :  { %1542 = vmatpush3.bf16.msra.mxu1 %v1670_v50 }
  0xb6   :  { %1543 = vmatprep.subr.bf16.mxu1 %v1805_v19 }
  0xb7   :  { %1558 = vmatpush3.bf16.msra.mxu0 %v1676_v56 }
  0xb8   :  { %1559 = vmatprep.subr.bf16.mxu0 %v1805_v19 }
  0xb9   :  { %1544 = vmatpush3.bf16.msra.mxu1 %v1671_v51 }
  0xba   :  { %1545 = vmatprep.subr.bf16.mxu1 %v1805_v19 }
  0xbb   :  { %1560 = vmatpush3.bf16.msra.mxu0 %v1677_v57 }
  0xbc   :  { %1561 = vmatprep.subr.bf16.mxu0 %v1805_v19 }
  0xbd   :  { %1546 = vmatpush3.bf16.msra.mxu1 %v1672_v52 }
  0xbf   :  { %1562 = vmatpush3.bf16.msra.mxu0 %v1678_v58 }
  0xc0   :  { %1563 = vmatprep.subr.bf16.mxu0 %v1805_v19 }
  0xc3   :  { %1564 = vmatpush3.bf16.msra.mxu0 %v1679_v34 }
  0xc4   :  { %1565 = vmatprep.subr.bf16.mxu0 %v1805_v19 }
  0xc7   :  { %1566 = vmatpush3.bf16.msra.mxu0 %v1680_v35 }
 0x13d   :  { %v1399_v59 = vpop.f32.mrb[0].mxu0 }
 0x13e   :  { %v1400_v61 = vpop.f32.mrb[1].mxu0 }
 0x13f   :  { %v1401_v62 = vadd.f32 %v1400_v61, %v1399_v59  ;;  %v1402_v63 = vpop.f32.mrb[2].mxu0  ;;  %v1421_v0 = vpop.f32.mrb[0].mxu1 }
 0x140   :  { %v1403_v1 = vpop.f32.mrb[3].mxu0  ;;  %v1422_v3 = vpop.f32.mrb[1].mxu1 }
 0x141   :  { %v829_v2 = vadd.f32 %v1401_v62, %v1278_v60  ;;  %v1423_v4 = vadd.f32 %v1422_v3, %v1421_v0  ;;  %v1424_v5 = vpop.f32.mrb[2].mxu1 }
 0x142   :  { %v1425_v6 = vpop.f32.mrb[3].mxu1 }
 0x143   :  { %v869_v7 = vadd.f32 %v1423_v4, %v829_v2 }
 0x15d   :  { %v1443_v8 = vpop.f32.mrb[4].mxu0 }
 0x15e   :  { %v1444_v9 = vpop.f32.mrb[5].mxu0 }
 0x15f   :  { %v1445_v10 = vadd.f32 %v1444_v9, %v1443_v8  ;;  %v1446_v11 = vpop.f32.mrb[6].mxu0  ;;  %v1465_v12 = vpop.f32.mrb[4].mxu1 }
 0x160   :  { %v1447_v13 = vpop.f32.mrb[7].mxu0  ;;  %v1466_v15 = vpop.f32.mrb[5].mxu1 }
 0x161   :  { %v909_v14 = vadd.f32 %v1445_v10, %v869_v7  ;;  %v1467_v16 = vadd.f32 %v1466_v15, %v1465_v12  ;;  %v1468_v17 = vpop.f32.mrb[6].mxu1 }
 0x162   :  { %v1469_v18 = vpop.f32.mrb[7].mxu1 }
 0x163   :  { %v949_v20 = vadd.f32 %v1467_v16, %v909_v14 }
 0x173   :  { %v1028_v21 = vpop.f32.mrb[8].mxu1 }
 0x174   :  { %v1529_v22 = vpop.f32.mrb[9].mxu1 }
 0x175   :  { %v1031_v23 = vpop.f32.mrb[10].mxu1 }
 0x176   :  { %v1530_v24 = vpop.f32.mrb[11].mxu1 }
 0x17d   :  { %v1487_v25 = vpop.f32.mrb[8].mxu0 }
 0x17e   :  { %v1488_v26 = vpop.f32.mrb[9].mxu0 }
 0x17f   :  { %v1489_v27 = vadd.f32 %v1488_v26, %v1487_v25  ;;  %v1490_v28 = vpop.f32.mrb[10].mxu0 }
 0x180   :  { %v1491_v29 = vpop.f32.mrb[11].mxu0 }
 0x181   :  { %v989_v30 = vadd.f32 %v1489_v27, %v949_v20 }
 0x183   :  { %v1029_v31 = vadd.f32 %v1028_v21, %v989_v30 }
 0x185   :  { %v1034_v32 = vmax.f32 %v1029_v31, 0.0 }
 0x187   :  { %v1035_v33 = vpack.c.bf16 %v1034_v32, %v1034_v32 }
 0x189   :  { %1548 = vmatmul.mubr.bf16.vlgmr.msra.gmra.mrb[12].mxu1 %v1035_v33 }
 0x25c   :  { %v1141_v37 = vpop.f32.mrb[12].mxu1 }
 0x25d   :  { %v1142_v38 = vadd.f32 %v1365_v36, %v1141_v37  ;;  %v1549_v39 = vpop.f32.mrb[13].mxu1 }
 0x25e   :  { %v1144_v40 = vpop.f32.mrb[14].mxu1 }
 0x25f   :  { %v1147_v41 = vmax.f32 %v1142_v38, 0.0  ;;  %v1550_v42 = vpop.f32.mrb[15].mxu1 }
 0x261   :  { %v1148_v43 = vpack.c.bf16 %v1147_v41, %v1147_v41 }
 0x263   :  { %1568 = vmatmul.mubr.bf16.vlgmr.msra.gmra.mrb[12].mxu0 %v1148_v43 }
 0x336   :  { %v1254_v19 = vpop.f32.mrb[12].mxu0 }
 0x337   :  { %v1255_v45 = vadd.f32 %v1374_v44, %v1254_v19  ;;  %v1569_v46 = vpop.f32.mrb[13].mxu0 }
 0x338   :  { %v1257_v47 = vpop.f32.mrb[14].mxu0 }
 0x339   :  { %1260 = vst [vmem:[#allocation10] sm:$0xff] %v1255_v45  ;;  %v1570_v48 = vpop.f32.mrb[15].mxu0 }
 0x33a   :  { %1780 = shalt.err (!%p1777_p8)
}
 0x33b   :  { %s1781_s6 = scalar_lea.hbm %s1961_s7, 128 }
 0x33c   :  { %p1782_p9 = scmp.ne.s32.totalorder %s1961_s7, %s1781_s6  ;;  %p1785_p10 = scmp.lt.u32.totalorder %s1781_s6, %s1961_s7 }
 0x33e   :  { %p1787_p11 = pnand %p1785_p10, %p1782_p9 }
 0x340   :  { %1790 = shalt.err (!%p1787_p11)
}
 0x341   :  { %1270 = dma.vmem_to_hbm [thread:$0]  %s1268_s29, 128, %s1961_s7, [#allocation4]  }
 0x342   :  { %1797 = dma.done.wait [#allocation4], 128  }
 0x343   :  { %1798 = vsyncadd [#allocation4], 4294967168 }
 0x344   :  { %1274 = vsyncpa [#allocation3], 1 }
 0x345   :  { %1275 = vsyncpa [#allocation6], 1 }
 0x346   :  { %1276 = vsyncpa [#allocation9], 1 }
 0x347   :  { %1277 = vsyncpa [#allocation4], 1 }

</bundles_post_ra>
